<compile_context>
chip_gen: v7x
topology: tpu7x:2x2x1
jax: 0.10.0
libtpu: 0.0.40
codegen_flags: <defaults>
</compile_context>

<pallas_src>
import jax
import jax.numpy as jnp
from jax.experimental import pallas as pl
from jax.experimental.pallas import tpu as pltpu


def _round_up(n, m):
    return ((n + m - 1) // m) * m


def mlpnet_kernel(x_ref, mk_ref, mv_ref, w12_ref, b12_ref,
                  w3_ref, b3_ref, wp_ref, bp_ref, out_ref):
    x = x_ref[...]                                                        # (F, bm)

    # --- ExternalAttention (transposed, lane-dense layout) -----------------
    attn = jnp.dot(mk_ref[...], x, preferred_element_type=jnp.float32)    # (S, bm)
    m = jnp.max(attn, axis=0, keepdims=True)                              # (1, bm)
    e = jnp.exp(attn - m)
    # softmax over the S axis; the module's second `attn / sum(attn)` renorm
    # is mathematically a no-op and is folded into this single reciprocal.
    attn = e * pl.reciprocal(jnp.sum(e, axis=0, keepdims=True), approx=True)
    x = jnp.dot(mv_ref[...], attn, preferred_element_type=jnp.float32) + x  # (F, bm)

    # --- MLP (hidden1+hidden2 folded into one affine in the wrapper) -------
    h2 = jnp.dot(w12_ref[...], x, preferred_element_type=jnp.float32) + b12_ref[...]
    h3 = jnp.dot(w3_ref[...], h2, preferred_element_type=jnp.float32) + b3_ref[...]
    h3 = jnp.maximum(h3, 0.0)
    out = jnp.dot(wp_ref[...], h3, preferred_element_type=jnp.float32) + bp_ref[...]

    out_ref[...] = out.astype(out_ref.dtype)


def mlpnet_forward(x, params, *, bm=2048):
    """x: (B, n_feature) f32.  params: PyTorch-layout (out, in) weights, (out, 1) biases."""
    B, F = x.shape
    n_output = params["bp"].shape[0]

    # Fold hidden1 -> hidden2 (two consecutive affine layers, no nonlinearity).
    w12 = jnp.dot(params["w2"], params["w1"])                     # (h2, F)
    b12 = jnp.dot(params["w2"], params["b1"]) + params["b2"]      # (h2, 1)

    # Lane-dense layout: batch on the 128-lane axis.
    xT = x.T.astype(jnp.float32)                                  # (F, B)

    # Lane-aligned block size; pad B so the grid tiles evenly.
    if B >= 128:
        bm_eff = max(128, (min(bm, _round_up(B, 128)) // 128) * 128)
        b_pad = _round_up(B, bm_eff)
    else:
        bm_eff = B          # single full block; no lane constraint when == full dim
        b_pad = B
    if b_pad != B:
        xT = jnp.pad(xT, ((0, 0), (0, b_pad - B)))
    grid = (b_pad // bm_eff,)

    stream = lambda shape: pl.BlockSpec(shape, lambda i: (0, i))
    resident = lambda arr: pl.BlockSpec(arr.shape, lambda i: (0, 0))

    weights = (params["mk"], params["mv"], w12, b12,
               params["w3"], params["b3"], params["wp"], params["bp"])

    outT = pl.pallas_call(
        mlpnet_kernel,
        out_shape=jax.ShapeDtypeStruct((n_output, b_pad), jnp.float32),
        grid=grid,
        in_specs=[stream((F, bm_eff))] + [resident(w) for w in weights],
        out_specs=stream((n_output, bm_eff)),
        compiler_params=pltpu.CompilerParams(
            dimension_semantics=("parallel",),
            vmem_limit_bytes=32 * 1024 * 1024),
    )(xT, *weights)

    return outT[:, :B].T                                          # (B, n_output)


def init_params(key, n_feature=3, n_hidden1=32, n_hidden2=32, n_hidden3=32,
                n_output=4, S=64):
    """Deterministic synthetic parameters, PyTorch (out, in) weight layout.

    ExternalAttention linears use std=0.001 normal (as in init_weights); the
    MLP linears use a small deterministic normal init (synthetic stand-in for
    PyTorch's default Linear init)."""
    ks = jax.random.split(key, 10)
    p = {}
    # ExternalAttention: mk: Linear(3->S, no bias), mv: Linear(S->3, no bias)
    p["mk"] = 0.001 * jax.random.normal(ks[0], (S, n_feature), jnp.float32)
    p["mv"] = 0.001 * jax.random.normal(ks[1], (n_feature, S), jnp.float32)
    # MLP linears (out, in); biases (out, 1).
    p["w1"] = 0.1 * jax.random.normal(ks[2], (n_hidden1, n_feature), jnp.float32)
    p["b1"] = 0.1 * jax.random.normal(ks[3], (n_hidden1, 1), jnp.float32)
    p["w2"] = 0.1 * jax.random.normal(ks[4], (n_hidden2, n_hidden1), jnp.float32)
    p["b2"] = 0.1 * jax.random.normal(ks[5], (n_hidden2, 1), jnp.float32)
    p["w3"] = 0.1 * jax.random.normal(ks[6], (n_hidden3, n_hidden2), jnp.float32)
    p["b3"] = 0.1 * jax.random.normal(ks[7], (n_hidden3, 1), jnp.float32)
    p["wp"] = 0.1 * jax.random.normal(ks[8], (n_output, n_hidden3), jnp.float32)
    p["bp"] = 0.1 * jax.random.normal(ks[9], (n_output, 1), jnp.float32)
    return p


def _reference(x, p):
    """Pure-JAX reference of the original (unfolded) forward, (B, F) layout."""
    attn = x @ p["mk"].T
    attn = jax.nn.softmax(attn, axis=1)
    attn = attn / jnp.sum(attn, axis=1, keepdims=True)
    x = attn @ p["mv"].T + x
    h1 = x @ p["w1"].T + p["b1"].T
    h2 = h1 @ p["w2"].T + p["b2"].T
    h3 = jnp.maximum(h2 @ p["w3"].T + p["b3"].T, 0.0)
    return h3 @ p["wp"].T + p["bp"].T


if __name__ == "__main__":
    key = jax.random.PRNGKey(0)
    k_x, k_p = jax.random.split(key)

    B, n_feature = 300, 3        # ea(d_model=3) forces n_feature == 3
    n_h1 = n_h2 = n_h3 = 32
    n_output = 4

    x = jax.random.normal(k_x, (B, n_feature), jnp.float32)
    params = init_params(k_p, n_feature, n_h1, n_h2, n_h3, n_output)

    # bm=128 keeps the test small while exercising the batch grid (3 steps)
    # and the pad-to-block path (300 -> 384 lanes).
    out = mlpnet_forward(x, params, bm=128)
    out = jax.block_until_ready(out)

    ref = _reference(x, params)
    assert out.shape == (B, n_output)
    assert jnp.allclose(out, ref, atol=1e-4, rtol=1e-3), float(
        jnp.max(jnp.abs(out - ref)))

    print("KERNEL_OK")
</pallas_src>

<mosaic_0001>
module attributes {stable_mosaic.version = 11 : i64} {
  func.func @mlpnet_kernel(%arg0: i32, %arg1: memref<3x128xf32, #tpu.memory_space<vmem>>, %arg2: memref<64x3xf32, #tpu.memory_space<vmem>>, %arg3: memref<3x64xf32, #tpu.memory_space<vmem>>, %arg4: memref<32x3xf32, #tpu.memory_space<vmem>>, %arg5: memref<32x1xf32, #tpu.memory_space<vmem>>, %arg6: memref<32x32xf32, #tpu.memory_space<vmem>>, %arg7: memref<32x1xf32, #tpu.memory_space<vmem>>, %arg8: memref<4x32xf32, #tpu.memory_space<vmem>>, %arg9: memref<4x1xf32, #tpu.memory_space<vmem>>, %arg10: memref<4x128xf32, #tpu.memory_space<vmem>>) attributes {dimension_semantics = [#tpu.dimension_semantics<parallel>], iteration_bounds = array<i64: 3>, scalar_prefetch = 0 : i64, scratch_operands = 0 : i64, tpu.core_type = #tpu.core_type<tc>, window_params = [{transform_indices = @transform_0, window_bounds = array<i64: 3, 128>}, {pipeline_mode = #tpu.pipeline_mode<synchronous>, transform_indices = @transform_1, window_bounds = array<i64: 64, 3>}, {pipeline_mode = #tpu.pipeline_mode<synchronous>, transform_indices = @transform_2, window_bounds = array<i64: 3, 64>}, {pipeline_mode = #tpu.pipeline_mode<synchronous>, transform_indices = @transform_3, window_bounds = array<i64: 32, 3>}, {pipeline_mode = #tpu.pipeline_mode<synchronous>, transform_indices = @transform_4, window_bounds = array<i64: 32, 1>}, {pipeline_mode = #tpu.pipeline_mode<synchronous>, transform_indices = @transform_5, window_bounds = array<i64: 32, 32>}, {pipeline_mode = #tpu.pipeline_mode<synchronous>, transform_indices = @transform_6, window_bounds = array<i64: 32, 1>}, {pipeline_mode = #tpu.pipeline_mode<synchronous>, transform_indices = @transform_7, window_bounds = array<i64: 4, 32>}, {pipeline_mode = #tpu.pipeline_mode<synchronous>, transform_indices = @transform_8, window_bounds = array<i64: 4, 1>}, {transform_indices = @transform_9, window_bounds = array<i64: 4, 128>}]} {
    %c0 = arith.constant 0 : index
    %c0_0 = arith.constant 0 : index
    %0 = vector.load %arg1[%c0, %c0_0] : memref<3x128xf32, #tpu.memory_space<vmem>>, vector<3x128xf32>
    %c0_1 = arith.constant 0 : index
    %c0_2 = arith.constant 0 : index
    %1 = vector.load %arg2[%c0_1, %c0_2] : memref<64x3xf32, #tpu.memory_space<vmem>>, vector<64x3xf32>
    %cst = arith.constant dense<0.000000e+00> : vector<64x128xf32>
    %2 = tpu.matmul %1, %0, %cst {dimension_numbers = #tpu.dot_dimension_numbers<[1], [0], [0], [1], [0, 0, 1, 1], [], []>} : vector<64x3xf32>, vector<3x128xf32>, vector<64x128xf32> -> vector<64x128xf32>
    %cst_3 = arith.constant dense<0xFF800000> : vector<128xf32>
    %3 = vector.multi_reduction <maximumf>, %2, %cst_3 [0] : vector<64x128xf32> to vector<128xf32>
    %4 = vector.shape_cast %3 : vector<128xf32> to vector<1x128xf32>
    %5 = vector.broadcast %4 : vector<1x128xf32> to vector<64x128xf32>
    %6 = arith.subf %2, %5 : vector<64x128xf32>
    %7 = math.exp %6 : vector<64x128xf32>
    %cst_4 = arith.constant dense<0.000000e+00> : vector<128xf32>
    %8 = vector.multi_reduction <add>, %7, %cst_4 [0] : vector<64x128xf32> to vector<128xf32>
    %9 = vector.shape_cast %8 : vector<128xf32> to vector<1x128xf32>
    %10 = tpu.reciprocal %9 {approx = true} : vector<1x128xf32> -> vector<1x128xf32>
    %11 = vector.broadcast %10 : vector<1x128xf32> to vector<64x128xf32>
    %12 = arith.mulf %7, %11 : vector<64x128xf32>
    %c0_5 = arith.constant 0 : index
    %c0_6 = arith.constant 0 : index
    %13 = vector.load %arg3[%c0_5, %c0_6] : memref<3x64xf32, #tpu.memory_space<vmem>>, vector<3x64xf32>
    %cst_7 = arith.constant dense<0.000000e+00> : vector<3x128xf32>
    %14 = tpu.matmul %13, %12, %cst_7 {dimension_numbers = #tpu.dot_dimension_numbers<[1], [0], [0], [1], [0, 0, 1, 1], [], []>} : vector<3x64xf32>, vector<64x128xf32>, vector<3x128xf32> -> vector<3x128xf32>
    %15 = arith.addf %14, %0 : vector<3x128xf32>
    %c0_8 = arith.constant 0 : index
    %c0_9 = arith.constant 0 : index
    %16 = vector.load %arg4[%c0_8, %c0_9] : memref<32x3xf32, #tpu.memory_space<vmem>>, vector<32x3xf32>
    %cst_10 = arith.constant dense<0.000000e+00> : vector<32x128xf32>
    %17 = tpu.matmul %16, %15, %cst_10 {dimension_numbers = #tpu.dot_dimension_numbers<[1], [0], [0], [1], [0, 0, 1, 1], [], []>} : vector<32x3xf32>, vector<3x128xf32>, vector<32x128xf32> -> vector<32x128xf32>
    %c0_11 = arith.constant 0 : index
    %c0_12 = arith.constant 0 : index
    %18 = vector.load %arg5[%c0_11, %c0_12] : memref<32x1xf32, #tpu.memory_space<vmem>>, vector<32x1xf32>
    %19 = vector.broadcast %18 : vector<32x1xf32> to vector<32x128xf32>
    %20 = arith.addf %17, %19 : vector<32x128xf32>
    %c0_13 = arith.constant 0 : index
    %c0_14 = arith.constant 0 : index
    %21 = vector.load %arg6[%c0_13, %c0_14] : memref<32x32xf32, #tpu.memory_space<vmem>>, vector<32x32xf32>
    %cst_15 = arith.constant dense<0.000000e+00> : vector<32x128xf32>
    %22 = tpu.matmul %21, %20, %cst_15 {dimension_numbers = #tpu.dot_dimension_numbers<[1], [0], [0], [1], [0, 0, 1, 1], [], []>} : vector<32x32xf32>, vector<32x128xf32>, vector<32x128xf32> -> vector<32x128xf32>
    %c0_16 = arith.constant 0 : index
    %c0_17 = arith.constant 0 : index
    %23 = vector.load %arg7[%c0_16, %c0_17] : memref<32x1xf32, #tpu.memory_space<vmem>>, vector<32x1xf32>
    %24 = vector.broadcast %23 : vector<32x1xf32> to vector<32x128xf32>
    %25 = arith.addf %22, %24 : vector<32x128xf32>
    %cst_18 = arith.constant 0.000000e+00 : f32
    %26 = vector.broadcast %cst_18 : f32 to vector<32x128xf32>
    %27 = arith.maximumf %25, %26 : vector<32x128xf32>
    %c0_19 = arith.constant 0 : index
    %c0_20 = arith.constant 0 : index
    %28 = vector.load %arg8[%c0_19, %c0_20] : memref<4x32xf32, #tpu.memory_space<vmem>>, vector<4x32xf32>
    %cst_21 = arith.constant dense<0.000000e+00> : vector<4x128xf32>
    %29 = tpu.matmul %28, %27, %cst_21 {dimension_numbers = #tpu.dot_dimension_numbers<[1], [0], [0], [1], [0, 0, 1, 1], [], []>} : vector<4x32xf32>, vector<32x128xf32>, vector<4x128xf32> -> vector<4x128xf32>
    %c0_22 = arith.constant 0 : index
    %c0_23 = arith.constant 0 : index
    %30 = vector.load %arg9[%c0_22, %c0_23] : memref<4x1xf32, #tpu.memory_space<vmem>>, vector<4x1xf32>
    %31 = vector.broadcast %30 : vector<4x1xf32> to vector<4x128xf32>
    %32 = arith.addf %29, %31 : vector<4x128xf32>
    %c0_24 = arith.constant 0 : index
    %c0_25 = arith.constant 0 : index
    %33 = vector.load %arg10[%c0_24, %c0_25] : memref<4x128xf32, #tpu.memory_space<vmem>>, vector<4x128xf32>
    tpu.vector_store %arg10[%c0_24, %c0_25], %32 {strides = array<i32>} : memref<4x128xf32, #tpu.memory_space<vmem>>, vector<4x128xf32>,
    return
  }
  func.func @transform_0(%arg0: i32) -> (i32, i32) {
    %c0_i32 = arith.constant 0 : i32
    %c0_i32_0 = arith.constant 0 : i32
    return %c0_i32, %arg0 : i32, i32
  }
  func.func @transform_1(%arg0: i32) -> (i32, i32) {
    %c0_i32 = arith.constant 0 : i32
    %c0_i32_0 = arith.constant 0 : i32
    %c0_i32_1 = arith.constant 0 : i32
    return %c0_i32, %c0_i32_0 : i32, i32
  }
  func.func @transform_2(%arg0: i32) -> (i32, i32) {
    %c0_i32 = arith.constant 0 : i32
    %c0_i32_0 = arith.constant 0 : i32
    %c0_i32_1 = arith.constant 0 : i32
    return %c0_i32, %c0_i32_0 : i32, i32
  }
  func.func @transform_3(%arg0: i32) -> (i32, i32) {
    %c0_i32 = arith.constant 0 : i32
    %c0_i32_0 = arith.constant 0 : i32
    %c0_i32_1 = arith.constant 0 : i32
    return %c0_i32, %c0_i32_0 : i32, i32
  }
  func.func @transform_4(%arg0: i32) -> (i32, i32) {
    %c0_i32 = arith.constant 0 : i32
    %c0_i32_0 = arith.constant 0 : i32
    %c0_i32_1 = arith.constant 0 : i32
    return %c0_i32, %c0_i32_0 : i32, i32
  }
  func.func @transform_5(%arg0: i32) -> (i32, i32) {
    %c0_i32 = arith.constant 0 : i32
    %c0_i32_0 = arith.constant 0 : i32
    %c0_i32_1 = arith.constant 0 : i32
    return %c0_i32, %c0_i32_0 : i32, i32
  }
  func.func @transform_6(%arg0: i32) -> (i32, i32) {
    %c0_i32 = arith.constant 0 : i32
    %c0_i32_0 = arith.constant 0 : i32
    %c0_i32_1 = arith.constant 0 : i32
    return %c0_i32, %c0_i32_0 : i32, i32
  }
  func.func @transform_7(%arg0: i32) -> (i32, i32) {
    %c0_i32 = arith.constant 0 : i32
    %c0_i32_0 = arith.constant 0 : i32
    %c0_i32_1 = arith.constant 0 : i32
    return %c0_i32, %c0_i32_0 : i32, i32
  }
  func.func @transform_8(%arg0: i32) -> (i32, i32) {
    %c0_i32 = arith.constant 0 : i32
    %c0_i32_0 = arith.constant 0 : i32
    %c0_i32_1 = arith.constant 0 : i32
    return %c0_i32, %c0_i32_0 : i32, i32
  }
  func.func @transform_9(%arg0: i32) -> (i32, i32) {
    %c0_i32 = arith.constant 0 : i32
    %c0_i32_0 = arith.constant 0 : i32
    return %c0_i32, %arg0 : i32, i32
  }
}

</mosaic_0001>

<bundles_post_ra>
// kernel: tpu_custom_call.1
= control target key start
LH: loop header
LB: loop body
LE: loop exit
PB: predicated region body
PF: predicated region fallthrough
CT: control target
= control target key end

     0   :  { %14 = vsyncpa [#allocation3], 0  ;;  %s1574_s0 = inlined_call_operand.vmem [shape: f32[3,384], index: 0, kind: input, shape index: {}]   ;;  %s1575_s1 = inlined_call_operand.vmem [shape: f32[64,3], index: 1, kind: input, shape index: {}]   ;;  %s1576_s2 = inlined_call_operand.vmem [shape: f32[3,64], index: 2, kind: input, shape index: {}]   ;;  %s1577_s3 = inlined_call_operand.vmem [shape: f32[32,3], index: 3, kind: input, shape index: {}]   ;;  %s1578_s4 = inlined_call_operand.vmem [shape: f32[32,1], index: 4, kind: input, shape index: {}]   ;;  %s1579_s5 = inlined_call_operand.vmem [shape: f32[32,32], index: 5, kind: input, shape index: {}]   ;;  %s1580_s6 = inlined_call_operand.vmem [shape: f32[32,1], index: 6, kind: input, shape index: {}]   ;;  %s1581_s7 = inlined_call_operand.vmem [shape: f32[4,32], index: 7, kind: input, shape index: {}]   ;;  %s1582_s8 = inlined_call_operand.vmem [shape: f32[4,1], index: 8, kind: input, shape index: {}]   ;;  %s1583_s9 = inlined_call_operand.hbm [shape: f32[4,384], index: 9, kind: output, shape index: {}]  }
   0x1   :  { %16 = vsyncpa [#allocation3 + $0x1], 0  ;;  %s1357_s30 = smov 0   ;;  %s1359_s10 = smov 0  }
   0x2   :  { %s1361_s11 = smov 0   ;;  %s1363_s12 = smov 0  }
   0x3 LB: > { %s1378_s13 = sadd.s32 4294967295, %s1300_s12   ;;  %s1017_s14 = sadd.s32 4294967294, %s1300_s12   ;;  %s1300_s12 = sphi %s1363_s12, %s1589_s12   ;;  %s1296_s11 = sphi %s1361_s11, %s1588_s11   ;;  %s1292_s10 = sphi %s1359_s10, %s1587_s10   ;;  %s1288_s30 = sphi %s1357_s30, %s1586_s30  }
   0x4   : > { %s1382_s15 = sadd.s32 1, %s1300_s12   ;;  %s223_s16 = sadd.s32 1, %s1296_s11 }
   0x5   : > { %s220_s17 = ssub.s32 %s1300_s12, %s1382_s15  ;;  %p233_p0 = scmp.ne.s32.totalorder %s1296_s11, %s1292_s10 }
   0x6   : > { %p221_p1 = scmp.eq.s32.totalorder %s220_s17, 0  ;;  %p234_p2 = scmp.eq.s32.totalorder %s1378_s13, 2 }
   0x7   : > { %p239_p3 = scmp.ne.s32.totalorder %s1292_s10, %s1288_s30  ;;  %p240_p4 = scmp.eq.s32.totalorder %s1017_s14, 2 }
   0x8   : > { %s1393_s18 = scalar_select %p221_p1, %s1296_s11, %s223_s16  }
   0x9   : > { %p1395_p5 = por %p234_p2, %p233_p0  ;;  %p1399_p6 = por %p240_p4, %p239_p3 }
   0xa   : > { %p1020_p7 = scmp.ge.s32.totalorder %s1300_s12, 1  ;;  %p289_p8 = scmp.lt.s32.totalorder %s1300_s12, 4 }
   0xc   : > { %p290_p9 = pnand %p1020_p7, %p289_p8 }
   0xd   : > { %p324_p10 = scmp.lt.s32.totalorder (!%p290_p9), %s1378_s13, 2  ;;  %v329_v0 = vld [vmem:[%s1575_s1] sm:$0xff] (!%p290_p9)  ;;  %vm337_vm0 = vcmask (!%p290_p9), 23552   ;;  %vm362_vm1 = vcmask (!%p290_p9), 1042432   ;;  %v330_v2 = vld [vmem:[%s1575_s1 + $0x8] sm:$0xff] (!%p290_p9)  ;;  %v331_v3 = vld [vmem:[%s1575_s1 + $0x10] sm:$0xff] (!%p290_p9) }
   0xe   : > { %293 = sbr.rel (%p290_p9) target bundleno = 1238 (0x4d6), region = 56  ;;  %1085 = vmatprep.mubr.msk.f32.mxu0 (!%p290_p9), %vm337_vm0, %v329_v0  ;;  %v332_v4 = vld [vmem:[%s1575_s1 + $0x18] sm:$0xff] (!%p290_p9)  ;;  %v333_v5 = vld [vmem:[%s1575_s1 + $0x20] sm:$0xff] (!%p290_p9)  ;;  %v334_v6 = vld [vmem:[%s1575_s1 + $0x28] sm:$0xff] (!%p290_p9)  ;;  %v1302_v9 = vmov (!%p290_p9), 0.0|0.0   ;;  %vm1303_vm2 = vmmov (!%p290_p9), 0  }
   0xf   : > { %v335_v7 = vld [vmem:[%s1575_s1 + $0x30] sm:$0xff] (!%p290_p9)  ;;  %v336_v8 = vld [vmem:[%s1575_s1 + $0x38] sm:$0xff] (!%p290_p9)  ;;  %1149 = vmatprep.subr.bf16.mxu1 (!%p290_p9), %v1302_v9  ;;  %v1304_v10 = vmov (!%p290_p9), 0.0   ;;  %vm531_vm3 = vcmask (!%p290_p9), 523264   ;;  %vm761_vm4 = vcmask (!%p290_p9), 261120   ;;  %s321_s17 = sand.u32 (!%p290_p9), 1, %s1292_s10  }
  0x10   : > { %1113 = vmatprep.mubr.msk.f32.mxu1 (!%p290_p9), %vm1303_vm2, %v1304_v10  ;;  %s1021_s21 = sshll.u32 (!%p290_p9), %s321_s17, 2  ;;  %s1044_s22 = sshll.u32 (!%p290_p9), %s1378_s13, 6 }
  0x11   : > { %s945_s28 = scalar_lea.sflag (!%p290_p9), [#allocation3], %s321_s17 }
  0x15   : > { %s325_s23 = scalar_select %p324_p10, %s1378_s13, 2 }
  0x16   : > { %s1306_s13 = smov [#allocation2]  }
  0x17   : > { %s1022_s24 = sshll.u32 %s325_s23, 2  ;;  %s323_s23 = scalar_lea.vmem [#allocation2], %s1021_s21 }
  0x18   : > { %s327_s27 = scalar_lea.vmem %s1574_s0, %s1022_s24  ;;  %s958_s24 = sshll.u32 %s323_s23, 4  ;;  %s1534_s24 = int_to_ptr.vmem [resolvable:$true] %s958_s24 }
  0x19   : > { %v1414_v1 = vld [vmem:[%s327_s27] sm:$0x7]  ;;  %s1532_s27 = scalar_lea.hbm %s1583_s9, %s1044_s22  ;;  %s1238_s29 = scalar_lea.vmem %s1534_s24, 64 }
  0x1a   : > { %1083 = vmatprep.subr.msk.mxu0 %vm362_vm1, %v1414_v1  ;;  %p1239_p11 = scmp.ne.s32.totalorder %s1534_s24, %s1238_s29  ;;  %s1242_s14 = sshll.u32 %s1306_s13, 4  ;;  %s1243_s14 = int_to_ptr.vmem [resolvable:$false] %s1242_s14 }
  0x1b   : > { %1084 = vmatpush3.msk.msra.mxu0 %vm362_vm1, %v1414_v1  ;;  %s1244_s16 = scalar_lea.vmem %s1243_s14, 128  ;;  %p1245_p0 = scmp.lt.s32.totalorder %s1534_s24, %s1243_s14 }
  0x1c   : > { %1086 = vmatmul.mubr.msk.f32.vlgmr.msra.gmra.mrb[0].mxu0 %vm337_vm0, %v330_v2  ;;  %p1240_p12 = pnand %p1239_p11, %p1395_p5  ;;  %p1246_p1 = scmp.lt.s32.totalorder %s1244_s16, %s1238_s29 }
  0x1d   : > { %1088 = vmatprep.mubr.msk.f32.mxu0 %vm337_vm0, %v331_v3 }
  0x1e   : > { %p1241_p13 = pneg %p1240_p12  ;;  %p1247_p2 = por %p1246_p1, %p1245_p0 }
  0x20   : > { %1089 = vmatmul.mubr.msk.f32.gmra.mrb[2].mxu0 %vm337_vm0, %v332_v4  ;;  %p1248_p3 = pnand %p1247_p2, %p1241_p13 }
  0x21   : > { %1091 = vmatprep.mubr.msk.f32.mxu0 %vm337_vm0, %v333_v5 }
  0x24   : > { %1092 = vmatmul.mubr.msk.f32.gmra.mrb[4].mxu0 %vm337_vm0, %v334_v6 }
  0x25   : > { %1094 = vmatprep.mubr.msk.f32.mxu0 %vm337_vm0, %v335_v7 }
  0x28   : > { %1095 = vmatmul.mubr.msk.f32.gmra.mrb[6].mxu0 %vm337_vm0, %v336_v8 }
  0xef   : > { %v1087_v11 = vpop.f32.mrb[0].mxu0 }
  0xf0   : > { %v432_v12 = vpop.f32.mrb[1].mxu0 }
  0xf3   : > { %v1090_v13 = vpop.f32.mrb[2].mxu0 }
  0xf4   : > { %v442_v14 = vpop.f32.mrb[3].mxu0 }
  0xf7   : > { %v1093_v15 = vpop.f32.mrb[4].mxu0 }
  0xf8   : > { %v472_v16 = vmax.f32 %v1087_v11, %v1093_v15  ;;  %v452_v17 = vpop.f32.mrb[5].mxu0 }
  0xf9   : > { %v471_v18 = vmax.f32 %v432_v12, %v452_v17 }
  0xfb   : > { %v475_v19 = vmax.f32 %v471_v18, %v472_v16  ;;  %v1096_v20 = vpop.f32.mrb[6].mxu0 }
  0xfc   : > { %v474_v21 = vmax.f32 %v1090_v13, %v1096_v20  ;;  %v462_v22 = vpop.f32.mrb[7].mxu0 }
  0xfd   : > { %v473_v23 = vmax.f32 %v442_v14, %v462_v22 }
  0xff   : > { %v476_v24 = vmax.f32 %v473_v23, %v474_v21  ;;  %v530_v21 = vld [vmem:[%s1576_s2] sm:$0x7] }
 0x100   : > { %v609_v23 = vld [vmem:[%s1578_s4] sm:$0xff] }
 0x101   : > { %v477_v25 = vmax.f32 %v475_v19, %v476_v24  ;;  %v611_v24 = vld [vmem:[%s1578_s4 + $0x10] sm:$0xff] }
 0x103   : > { %v478_v26 = vrot.slane %v477_v25, 4 }
 0x105   : > { %v479_v27 = vmax.f32 %v477_v25, %v478_v26  ;;  %v1305_v25 = vmov 0   ;;  %v610_v26 = vld [vmem:[%s1578_s4 + $0x8] sm:$0xff] }
 0x106   : > { %1218 = vset.pattern.permute.xlu0 %v1305_v25  ;;  %1219 = vset.pattern.permute.xlu1 %v1305_v25 }
 0x107   : > { %v480_v28 = vrot.slane %v479_v27, 2  ;;  %615 = vperm.xlu0 %1218, %v609_v23   ;;  %625 = vperm.xlu1 %1219, %v611_v24  }
 0x109   : > { %v481_v29 = vmax.f32 %v479_v27, %v480_v28  ;;  %v612_v27 = vld [vmem:[%s1578_s4 + $0x18] sm:$0xff]  ;;  %v737_v28 = vld [vmem:[%s1580_s6] sm:$0xff] }
 0x10b   : > { %v482_v30 = vrot.slane %v481_v29, 1  ;;  %620 = vperm.xlu0 %1218, %v610_v26   ;;  %630 = vperm.xlu1 %1219, %v612_v27  }
 0x10d   : > { %v483_v31 = vmax.f32 %v481_v29, %v482_v30  ;;  %v738_v29 = vld [vmem:[%s1580_s6 + $0x8] sm:$0xff]  ;;  %v739_v30 = vld [vmem:[%s1580_s6 + $0x10] sm:$0xff] }
 0x10f   : > { %v484_v32 = vsub.f32 %v432_v12, %v483_v31  ;;  %v485_v33 = vsub.f32 %v1087_v11, %v483_v31  ;;  %v486_v34 = vsub.f32 %v442_v14, %v483_v31  ;;  %v487_v35 = vsub.f32 %v1090_v13, %v483_v31  ;;  %743 = vperm.xlu0 %1218, %v737_v28  }
 0x110   : > { %v488_v36 = vsub.f32 %v452_v17, %v483_v31  ;;  %v489_v37 = vsub.f32 %v1093_v15, %v483_v31  ;;  %v490_v38 = vsub.f32 %v462_v22, %v483_v31  ;;  %v491_v39 = vsub.f32 %v1096_v20, %v483_v31  ;;  %v605_v22 = vld [vmem:[%s1577_s3] sm:$0xff]  ;;  %748 = vperm.xlu1 %1219, %v738_v29   ;;  %v740_v31 = vld [vmem:[%s1580_s6 + $0x18] sm:$0xff] }
 0x111   : > { %v492_v40 = vmul.f32 1.442695, %v484_v32  ;;  %v494_v41 = vmul.f32 1.442695, %v485_v33  ;;  %v496_v42 = vmul.f32 1.442695, %v486_v34  ;;  %1118 = vmatprep.mubr.msk.f32.mxu0 %vm337_vm0, %v605_v22 }
 0x112   : > { %v498_v43 = vmul.f32 1.442695, %v487_v35  ;;  %v500_v44 = vmul.f32 1.442695, %v488_v36  ;;  %v502_v45 = vmul.f32 1.442695, %v489_v37 }
 0x113   : > { %1220 = vpow2.f32 %v492_v40  ;;  %v504_v46 = vmul.f32 1.442695, %v490_v38  ;;  %v506_v47 = vmul.f32 1.442695, %v491_v39  ;;  %753 = vperm.xlu0 %1218, %v739_v30   ;;  %v864_v32 = vld [vmem:[%s1582_s8] sm:$0xf] }
 0x114   : > { %1222 = vpow2.f32 %v494_v41  ;;  %758 = vperm.xlu1 %1219, %v740_v31   ;;  %v606_v36 = vld [vmem:[%s1577_s3 + $0x8] sm:$0xff]  ;;  %v607_v37 = vld [vmem:[%s1577_s3 + $0x10] sm:$0xff]  ;;  %v733_v38 = vld [vmem:[%s1579_s5] sm:$0xff] }
 0x115   : > { %1224 = vpow2.f32 %v496_v42 }
 0x116   : > { %1226 = vpow2.f32 %v498_v43 }
 0x117   : > { %1228 = vpow2.f32 %v500_v44  ;;  %867 = vperm.xlu0 %1218, %v864_v32  }
 0x118   : > { %1230 = vpow2.f32 %v502_v45 }
 0x119   : > { %1232 = vpow2.f32 %v504_v46 }
 0x11a   : > { %1234 = vpow2.f32 %v506_v47 }
 0x11d   : > { %v1221_v48 = vpop.eup %1220 }
 0x11e   : > { %v1223_v49 = vpop.eup %1222 }
 0x11f   : > { %v508_v50 = vadd.f32 %v1223_v49, %v1221_v48  ;;  %v1225_v51 = vpop.eup %1224 }
 0x120   : > { %v1227_v53 = vpop.eup %1226 }
 0x121   : > { %v509_v52 = vadd.f32 %v1225_v51, %v508_v50  ;;  %v1229_v55 = vpop.eup %1228 }
 0x122   : > { %v1231_v57 = vpop.eup %1230 }
 0x123   : > { %v510_v54 = vadd.f32 %v1227_v53, %v509_v52  ;;  %v1233_v59 = vpop.eup %1232  ;;  %v734_v52 = vld [vmem:[%s1579_s5 + $0x8] sm:$0xff] }
 0x124   : > { %v1235_v61 = vpop.eup %1234 }
 0x125   : > { %v511_v56 = vadd.f32 %v1229_v55, %v510_v54  ;;  %v736_v54 = vld [vmem:[%s1579_s5 + $0x18] sm:$0xff] }
 0x127   : > { %v512_v58 = vadd.f32 %v1231_v57, %v511_v56 }
 0x129   : > { %v513_v60 = vadd.f32 %v1233_v59, %v512_v58 }
 0x12b   : > { %v514_v62 = vadd.f32 %v1235_v61, %v513_v60 }
 0x12d   : > { %v515_v63 = vrot.slane %v514_v62, 4 }
 0x12f   : > { %v516_v0 = vadd.f32 %v515_v63, %v514_v62 }
 0x131   : > { %v517_v2 = vrot.slane %v516_v0, 2 }
 0x133   : > { %v518_v3 = vadd.f32 %v517_v2, %v516_v0 }
 0x135   : > { %v519_v4 = vrot.slane %v518_v3, 1 }
 0x137   : > { %v520_v5 = vadd.f32 %v519_v4, %v518_v3 }
 0x139   : > { %1236 = vrcp.f32 %v520_v5 }
 0x143   : > { %v1237_v6 = vpop.eup %1236 }
 0x144   : > { %v522_v7 = vmul.f32 %v1237_v6, %v1221_v48  ;;  %v523_v8 = vmul.f32 %v1237_v6, %v1223_v49  ;;  %v524_v11 = vmul.f32 %v1237_v6, %v1225_v51  ;;  %v525_v12 = vmul.f32 %v1237_v6, %v1227_v53  ;;  %v735_v53 = vld [vmem:[%s1579_s5 + $0x10] sm:$0xff] }
 0x145   : > { %v526_v13 = vmul.f32 %v1237_v6, %v1229_v55  ;;  %v527_v14 = vmul.f32 %v1237_v6, %v1231_v57  ;;  %v528_v15 = vmul.f32 %v1237_v6, %v1233_v59  ;;  %v529_v16 = vmul.f32 %v1237_v6, %v1235_v61 }
 0x146   : > { %v1150_v17 = vpack.c.bf16 %v523_v8, %v522_v7  ;;  %v1153_v18 = vpack.c.bf16 %v525_v12, %v524_v11  ;;  %v863_v12 = vld [vmem:[%s1581_s7] sm:$0xf] }
 0x147   : > { %v1156_v19 = vpack.c.bf16 %v527_v14, %v526_v13  ;;  %v1159_v20 = vpack.c.bf16 %v529_v16, %v528_v15 }
 0x148   : > { %1151 = vmatpush3.bf16.msra.mxu1 %v1150_v17 }
 0x149   : > { %1152 = vmatprep.subr.bf16.mxu1 %v1302_v9 }
 0x14c   : > { %1154 = vmatpush3.bf16.msra.mxu1 %v1153_v18 }
 0x14d   : > { %1155 = vmatprep.subr.bf16.mxu1 %v1302_v9 }
 0x150   : > { %1157 = vmatpush3.bf16.msra.mxu1 %v1156_v19 }
 0x151   : > { %1158 = vmatprep.subr.bf16.mxu1 %v1302_v9 }
 0x154   : > { %1160 = vmatpush3.bf16.msra.mxu1 %v1159_v20 }
 0x157   : > { %1114 = vmatmul.mubr.msk.f32.vlgmr.msra.gmra.mrb[0].mxu1 %vm531_vm3, %v530_v21 }
 0x158   : > { %1132 = vmatprep.mubr.msk.f32.mxu1 %vm761_vm4, %v733_v38 }
 0x186   : > { %v616_v39 = vpop.permute.xlu0 %615  ;;  %v626_v40 = vpop.permute.xlu1 %625 }
 0x18a   : > { %v621_v41 = vpop.permute.xlu0 %620  ;;  %v631_v48 = vpop.permute.xlu1 %630 }
 0x18e   : > { %v744_v56 = vpop.permute.xlu0 %743 }
 0x18f   : > { %v749_v55 = vpop.permute.xlu1 %748 }
 0x192   : > { %v754_v2 = vpop.permute.xlu0 %753 }
 0x193   : > { %v759_v62 = vpop.permute.xlu1 %758 }
 0x196   : > { %v868_v13 = vpop.permute.xlu0 %867 }
 0x22a   : > { %v601_v33 = vpop.f32.mrb[0].mxu1 }
 0x22b   : > { %v602_v34 = vadd.f32 %v601_v33, %v1414_v1  ;;  %v1115_v35 = vpop.f32.mrb[1].mxu1  ;;  %v608_v1 = vld [vmem:[%s1577_s3 + $0x18] sm:$0xff] }
 0x22d   : > { %1116 = vmatprep.subr.msk.mxu0 %vm362_vm1, %v602_v34 }
 0x22e   : > { %1117 = vmatpush3.msk.msra.mxu0 %vm362_vm1, %v602_v34 }
 0x22f   : > { %1119 = vmatmul.mubr.msk.f32.vlgmr.msra.gmra.mrb[8].mxu0 %vm337_vm0, %v606_v36  ;;  %1169 = vmatprep.subr.bf16.mxu0 %v1302_v9 }
 0x230   : > { %1121 = vmatprep.mubr.msk.f32.mxu0 %vm337_vm0, %v607_v37 }
 0x233   : > { %1122 = vmatmul.mubr.msk.f32.gmra.mrb[10].mxu0 %vm337_vm0, %v608_v1 }
 0x234   : > { %1146 = vmatprep.mubr.msk.f32.mxu0 %vm1303_vm2, %v1304_v10 }
 0x302   : > { %v1120_v42 = vpop.f32.mrb[8].mxu0 }
 0x303   : > { %v720_v43 = vadd.f32 %v1120_v42, %v621_v41  ;;  %v714_v44 = vpop.f32.mrb[9].mxu0 }
 0x304   : > { %v715_v45 = vadd.f32 %v714_v44, %v616_v39 }
 0x306   : > { %v1161_v46 = vpack.c.bf16 %v720_v43, %v715_v45  ;;  %v1123_v47 = vpop.f32.mrb[10].mxu0 }
 0x307   : > { %v730_v49 = vadd.f32 %v1123_v47, %v631_v48  ;;  %v724_v50 = vpop.f32.mrb[11].mxu0 }
 0x308   : > { %v725_v10 = vadd.f32 %v724_v50, %v626_v40  ;;  %1162 = vmatprep.subr.bf16.mxu1 %v1161_v46 }
 0x309   : > { %1164 = vmatpush3.bf16.msra.mxu1 %v1161_v46 }
 0x30a   : > { %v1165_v51 = vpack.c.bf16 %v730_v49, %v725_v10 }
 0x30c   : > { %1166 = vmatprep.subr.bf16.mxu1 %v1165_v51 }
 0x30d   : > { %1168 = vmatpush3.bf16.msra.mxu1 %v1165_v51 }
 0x310   : > { %1133 = vmatmul.mubr.msk.f32.vlgmr.msra.gmra.mrb[2].mxu1 %vm761_vm4, %v734_v52 }
 0x311   : > { %1135 = vmatprep.mubr.msk.f32.mxu1 %vm761_vm4, %v735_v53 }
 0x314   : > { %1136 = vmatmul.mubr.msk.f32.gmra.mrb[4].mxu1 %vm761_vm4, %v736_v54 }
 0x3e3   : > { %v1134_v57 = vpop.f32.mrb[2].mxu1 }
 0x3e4   : > { %v846_v58 = vadd.f32 %v1134_v57, %v749_v55  ;;  %v840_v59 = vpop.f32.mrb[3].mxu1 }
 0x3e5   : > { %v841_v60 = vadd.f32 %v840_v59, %v744_v56 }
 0x3e6   : > { %v860_v61 = vmax.f32 %v846_v58, 0.0 }
 0x3e7   : > { %v859_v63 = vmax.f32 %v841_v60, 0.0  ;;  %v1137_v0 = vpop.f32.mrb[4].mxu1 }
 0x3e8   : > { %v856_v3 = vadd.f32 %v1137_v0, %v759_v62  ;;  %v850_v4 = vpop.f32.mrb[5].mxu1 }
 0x3e9   : > { %v1170_v5 = vpack.c.bf16 %v860_v61, %v859_v63  ;;  %v851_v6 = vadd.f32 %v850_v4, %v754_v2 }
 0x3ea   : > { %v862_v7 = vmax.f32 %v856_v3, 0.0 }
 0x3eb   : > { %v861_v8 = vmax.f32 %v851_v6, 0.0  ;;  %1171 = vmatpush3.bf16.msra.mxu0 %v1170_v5 }
 0x3ec   : > { %1172 = vmatprep.subr.bf16.mxu0 %v1302_v9 }
 0x3ed   : > { %v1173_v11 = vpack.c.bf16 %v862_v7, %v861_v8 }
 0x3ef   : > { %1174 = vmatpush3.bf16.msra.mxu0 %v1173_v11 }
 0x3f2   : > { %1147 = vmatmul.mubr.msk.f32.vlgmr.msra.gmra.mrb[12].mxu0 %vm761_vm4, %v863_v12 }
 0x4c5   : > { %v939_v14 = vpop.f32.mrb[12].mxu0 }
 0x4c6   : > { %v940_v15 = vadd.f32 %v939_v14, %v868_v13  ;;  %v1148_v16 = vpop.f32.mrb[13].mxu0 }
 0x4c8   : > { %943 = vst [vmem:[%s323_s23] sm:$0xf] %v940_v15 }
 0x4c9   : > { %1251 = shalt.err (!%p1248_p3)
}
 0x4ca   : > { %s1252_s17 = scalar_lea.hbm %s1532_s27, 64  ;;  %s1256_s23 = scalar_lea.hbm %s1583_s9, 192 }
 0x4cb   : > { %p1253_p4 = scmp.ne.s32.totalorder %s1532_s27, %s1252_s17  ;;  %p1257_p9 = scmp.lt.u32.totalorder %s1532_s27, %s1583_s9 }
 0x4cc   : > { %p1258_p10 = scmp.lt.u32.totalorder %s1256_s23, %s1252_s17  ;;  %p1260_p12 = scmp.lt.u32.totalorder %s1252_s17, %s1532_s27 }
 0x4cd   : > { %p1254_p7 = pnand %p1253_p4, %p1395_p5 }
 0x4ce   : > { %p1259_p11 = por %p1258_p10, %p1257_p9 }
 0x4cf   : > { %p1255_p8 = pneg %p1254_p7 }
 0x4d0   : > { %p1261_p13 = por %p1260_p12, %p1259_p11 }
 0x4d2   : > { %p1262_p0 = pnand %p1261_p13, %p1255_p8 }
 0x4d4   : > { %1265 = shalt.err (!%p1262_p0)
}
 0x4d5   : > { %1175 = dma.vmem_to_hbm [thread:$0]  (%p1395_p5), %s1534_s24, 64, %s1532_s27, %s945_s28  }
 0x4d6 PF: > { %p1181_p1 = scmp.ge.s32.totalorder %s1300_s12, 2  ;;  %s970_s29 = sand.u32 1, %s1288_s30  }
 0x4d7   : > { %s971_s13 = scalar_lea.sflag [#allocation3], %s970_s29 }
 0x4d8   : > { %p1178_p2 = pnand %p1181_p1, %p1399_p6 }
 0x4da   : > { %1283 = dma.done.wait (!%p1178_p2), %s971_s13, 64  }
 0x4db   : > { %1285 = vsyncadd (!%p1178_p2), %s971_s13, 4294967232  ;;  %p19_p3 = scmp.ge.s32.totalorder %s1382_s15, 5   ;;  %s1586_s30 = smov %s1292_s10 }
 0x4dc   : > { %s1587_s10 = smov %s1296_s11  ;;  %s1588_s11 = smov %s1393_s18 }
 0x4dd   : > { %s1589_s12 = smov %s1382_s15  ;;  %21 = sbr.rel (!%p19_p3) target bundleno = 3 (0x3), region = 91 }
 0x4e4   :  { %976 = vsyncpa [#allocation3], 1 }
 0x4e5   :  { %978 = vsyncpa [#allocation3 + $0x1], 1 }

</bundles_post_ra>
